<compile_context>
chip_gen: v6e
topology: v6e:2x2x1
jax: 0.10.0
libtpu: 0.0.40
codegen_flags: <defaults>
</compile_context>

<pallas_src>
import jax
import jax.numpy as jnp
from jax.experimental import pallas as pl
from jax.experimental.pallas import tpu as pltpu


def _round_up(x, m):
    return (x + m - 1) // m * m


def _vmem_limit_bytes(frac=0.8, fallback=48 << 20):
    """~20% headroom below physical VMEM; conservative fallback fits every gen."""
    try:
        return int(pltpu.get_tpu_info().vmem_capacity_bytes * frac)
    except Exception:
        return fallback


def mlp_kernel(x_ref, w1_ref, b1_ref, w2_ref, b2_ref, o_ref, h_ref):
    # Linear 1 (+bias+ReLU) only once per batch tile: on the first N tile, write
    # h = relu(x @ W1 + b1) into the VMEM scratch; reuse it for all N tiles.
    @pl.when(pl.program_id(1) == 0)
    def _():
        # Per-tile cast of x to the MXU compute dtype (free under MXU slack).
        h = jnp.dot(x_ref[...].astype(w1_ref.dtype), w1_ref[...],
                    preferred_element_type=jnp.float32)
        h = jnp.maximum(h + b1_ref[...], 0.0)        # f32 epilogue (v5e-safe)
        h_ref[...] = h.astype(h_ref.dtype)           # cast once per batch tile

    # Linear 2 (BN already folded into W2'/b2'), one output-column tile.
    out = jnp.dot(h_ref[...], w2_ref[...], preferred_element_type=jnp.float32)
    o_ref[...] = (out + b2_ref[...]).astype(o_ref.dtype)


def prepare_params(w1, b1, gamma, beta, mean, var, w2, b2, *, eps=1e-5,
                   compute_dtype=jnp.bfloat16):
    """Fold eval-mode BN into the second Linear (exact), pad H to a multiple of
    128, and cast weights to the MXU compute dtype once (hoisted out of the
    per-call path). w1 is (D, H); w2 is (H, H), both pre-transposed (in, out).

    Note: casting the BN-folded W2' to bf16 applies gamma*rsqrt(var) before
    quantization; if accuracy is tight, use compute_dtype=jnp.float32."""
    D, H = w1.shape
    s = gamma * jax.lax.rsqrt(var + eps)              # (H,)
    t = beta - mean * s                               # (H,)
    w2_f = s[:, None] * w2                            # scale input rows of W2
    b2_f = b2 + t @ w2                                # (H,)

    Hp = _round_up(H, 128)                            # lane-dense output/hidden
    ph = Hp - H
    w1p = jnp.pad(w1, ((0, 0), (0, ph)))
    b1p = jnp.pad(b1, (0, ph))
    w2p = jnp.pad(w2_f, ((0, ph), (0, ph)))
    b2p = jnp.pad(b2_f, (0, ph))

    return dict(
        w1=w1p.astype(compute_dtype),
        b1=b1p.reshape(1, Hp).astype(jnp.float32),
        w2=w2p.astype(compute_dtype),
        b2=b2p.reshape(1, Hp).astype(jnp.float32),
        hidden=H,
        compute_dtype=compute_dtype,
    )


def mlp_forward(x, params, *, block_b=256, block_n=512, out_dtype=jnp.float32):
    """Fused MLP forward. x: (B, input_dim) float32 -> (B, hidden) out_dtype."""
    w1, b1, w2, b2 = params["w1"], params["b1"], params["w2"], params["b2"]
    H = params["hidden"]
    compute_dtype = params["compute_dtype"]
    B, D = x.shape
    Hp = w1.shape[1]

    # Batch tiling: TB multiple of 8, cdiv(B, TB) >= 2 for realistic B (v7x 2 TCs).
    TB = min(_round_up(B, 8), block_b)
    Bp = _round_up(B, TB)
    if Bp != B:
        x = jnp.pad(x, ((0, Bp - B), (0, 0)))
    nb = Bp // TB

    # Output-column tiling over the (already 128-padded) hidden dim.
    TN = Hp if Hp <= block_n else block_n
    if Hp % TN != 0:
        TN = 128
    nn = Hp // TN

    cost = pl.CostEstimate(
        flops=int(2 * Bp * Hp * (D + Hp)),
        transcendentals=0,
        bytes_accessed=int(x.size * x.dtype.itemsize
                           + w1.size * w1.dtype.itemsize
                           + b1.size * b1.dtype.itemsize
                           + w2.size * w2.dtype.itemsize
                           + b2.size * b2.dtype.itemsize
                           + Bp * Hp * jnp.dtype(out_dtype).itemsize),
    )

    def build(single_buffer_weights):
        res_kwargs = (dict(pipeline_mode=pl.Buffered(1))
                      if single_buffer_weights else {})

        def resident(shape):  # block index never changes -> one DMA, one buffer
            return pl.BlockSpec(shape, lambda i, j: (0,) * len(shape),
                                **res_kwargs)

        grid_spec = pltpu.PrefetchScalarGridSpec(
            num_scalar_prefetch=0,
            grid=(nb, nn),
            in_specs=[
                pl.BlockSpec((TB, D), lambda i, j: (i, 0)),   # x tile (no re-DMA over j)
                resident((D, Hp)),                            # W1 (VMEM-resident)
                resident((1, Hp)),                            # b1
                pl.BlockSpec((Hp, TN), lambda i, j: (0, j)),  # W2' column tile (pipelined)
                pl.BlockSpec((1, TN), lambda i, j: (0, j)),   # b2' column tile
            ],
            out_specs=pl.BlockSpec((TB, TN), lambda i, j: (i, j)),
            scratch_shapes=[pltpu.VMEM((TB, Hp), compute_dtype)],  # explicit h buffer
        )
        return pl.pallas_call(
            mlp_kernel,
            out_shape=jax.ShapeDtypeStruct((Bp, Hp), out_dtype),
            grid_spec=grid_spec,
            compiler_params=pltpu.CompilerParams(
                dimension_semantics=("parallel", "arbitrary"),
                vmem_limit_bytes=_vmem_limit_bytes(),
            ),
            cost_estimate=cost,
        )

    try:
        out = build(True)(x, w1, b1, w2, b2)
        jax.block_until_ready(out)
    except Exception:
        # TODO(synk): pl.Buffered(1) single-buffering rejected by this Pallas
        # build; fall back to default (double-buffered) resident weights.
        out = build(False)(x, w1, b1, w2, b2)

    return out[:B, :H]


def init_params(key, input_dim, hidden):
    """Matches MLP.model_init(): kaiming_normal_ (fan_in, gain=sqrt(2)) Linear
    weights, zero biases. BN params/buffers use non-trivial values so the fold
    is actually exercised (fresh PyTorch init would be gamma=1, beta=0, mean=0,
    var=1). PyTorch Linear weight is (out, in); stored transposed (in, out)."""
    k1, k2, k3, k4, k5, k6 = jax.random.split(key, 6)
    std1 = (2.0 / input_dim) ** 0.5
    std2 = (2.0 / hidden) ** 0.5
    w1 = (jax.random.normal(k1, (hidden, input_dim), jnp.float32) * std1).T
    w2 = (jax.random.normal(k2, (hidden, hidden), jnp.float32) * std2).T
    b1 = jnp.zeros((hidden,), jnp.float32)
    b2 = jnp.zeros((hidden,), jnp.float32)
    gamma = 1.0 + 0.1 * jax.random.normal(k3, (hidden,), jnp.float32)
    beta = 0.1 * jax.random.normal(k4, (hidden,), jnp.float32)
    mean = 0.1 * jax.random.normal(k5, (hidden,), jnp.float32)
    var = 1.0 + 0.1 * jax.random.uniform(k6, (hidden,), jnp.float32)
    return w1, b1, gamma, beta, mean, var, w2, b2


if __name__ == "__main__":
    B, input_dim, hidden = 8, 16, 32
    eps = 1e-5

    key = jax.random.PRNGKey(0)
    kx, kp = jax.random.split(key)
    x = jax.random.normal(kx, (B, input_dim), jnp.float32)
    w1, b1, gamma, beta, mean, var, w2, b2 = init_params(kp, input_dim, hidden)

    # Pure-JAX reference of the original (unfused, unfolded) eval-mode forward.
    h_ref = jnp.maximum(x @ w1 + b1, 0.0)
    h_ref = (h_ref - mean) * jax.lax.rsqrt(var + eps) * gamma + beta
    ref = h_ref @ w2 + b2

    # f32 compute path: tight check.
    p32 = prepare_params(w1, b1, gamma, beta, mean, var, w2, b2,
                         eps=eps, compute_dtype=jnp.float32)
    out32 = mlp_forward(x, p32)
    jax.block_until_ready(out32)
    assert out32.shape == (B, hidden)
    assert jnp.allclose(out32, ref, atol=1e-4, rtol=1e-4), (
        f"f32 mismatch: {jnp.max(jnp.abs(out32 - ref))}")

    # bf16 MXU path (default): loose check.
    pbf = prepare_params(w1, b1, gamma, beta, mean, var, w2, b2, eps=eps)
    outbf = mlp_forward(x, pbf)
    jax.block_until_ready(outbf)
    assert outbf.shape == (B, hidden)
    assert jnp.allclose(outbf, ref, atol=5e-2, rtol=5e-2), (
        f"bf16 mismatch: {jnp.max(jnp.abs(outbf - ref))}")

    print("KERNEL_OK")
</pallas_src>

<mosaic_0001>
module attributes {stable_mosaic.version = 11 : i64} {
  func.func @mlp_kernel(%arg0: i32, %arg1: i32, %arg2: memref<8x16xf32, #tpu.memory_space<vmem>>, %arg3: memref<16x128xf32, #tpu.memory_space<vmem>>, %arg4: memref<1x128xf32, #tpu.memory_space<vmem>>, %arg5: memref<128x128xf32, #tpu.memory_space<vmem>>, %arg6: memref<1x128xf32, #tpu.memory_space<vmem>>, %arg7: memref<8x128xf32, #tpu.memory_space<vmem>>, %arg8: memref<8x128xf32, #tpu.memory_space<vmem>>) attributes {dimension_semantics = [#tpu.dimension_semantics<parallel>, #tpu.dimension_semantics<arbitrary>], iteration_bounds = array<i64: 1, 1>, scalar_prefetch = 0 : i64, scratch_operands = 1 : i64, tpu.core_type = #tpu.core_type<tc>, window_params = [{transform_indices = @transform_0, window_bounds = array<i64: 8, 16>}, {pipeline_mode = #tpu.pipeline_mode<synchronous>, transform_indices = @transform_1, window_bounds = array<i64: 16, 128>}, {pipeline_mode = #tpu.pipeline_mode<synchronous>, transform_indices = @transform_2, window_bounds = array<i64: 1, 128>}, {transform_indices = @transform_3, window_bounds = array<i64: 128, 128>}, {transform_indices = @transform_4, window_bounds = array<i64: 1, 128>}, {transform_indices = @transform_5, window_bounds = array<i64: 8, 128>}]} {
    %c0_i32 = arith.constant 0 : i32
    %0 = arith.cmpi eq, %arg1, %c0_i32 : i32
    %1 = arith.extui %0 : i1 to i32
    %c0_i32_0 = arith.constant 0 : i32
    %2 = arith.cmpi ne, %1, %c0_i32_0 : i32
    scf.if %2 {
      %c0_8 = arith.constant 0 : index
      %c0_9 = arith.constant 0 : index
      %10 = vector.load %arg2[%c0_8, %c0_9] : memref<8x16xf32, #tpu.memory_space<vmem>>, vector<8x16xf32>
      %c0_10 = arith.constant 0 : index
      %c0_11 = arith.constant 0 : index
      %11 = vector.load %arg3[%c0_10, %c0_11] : memref<16x128xf32, #tpu.memory_space<vmem>>, vector<16x128xf32>
      %cst_12 = arith.constant dense<0.000000e+00> : vector<8x128xf32>
      %12 = tpu.matmul %10, %11, %cst_12 {dimension_numbers = #tpu.dot_dimension_numbers<[1], [0], [0], [1], [0, 0, 1, 1], [], []>} : vector<8x16xf32>, vector<16x128xf32>, vector<8x128xf32> -> vector<8x128xf32>
      %c0_13 = arith.constant 0 : index
      %c0_14 = arith.constant 0 : index
      %13 = vector.load %arg4[%c0_13, %c0_14] : memref<1x128xf32, #tpu.memory_space<vmem>>, vector<1x128xf32>
      %14 = vector.broadcast %13 : vector<1x128xf32> to vector<8x128xf32>
      %15 = arith.addf %12, %14 : vector<8x128xf32>
      %cst_15 = arith.constant 0.000000e+00 : f32
      %16 = vector.broadcast %cst_15 : f32 to vector<8x128xf32>
      %17 = arith.maximumf %15, %16 : vector<8x128xf32>
      %c0_16 = arith.constant 0 : index
      %c0_17 = arith.constant 0 : index
      %18 = vector.load %arg8[%c0_16, %c0_17] : memref<8x128xf32, #tpu.memory_space<vmem>>, vector<8x128xf32>
      tpu.vector_store %arg8[%c0_16, %c0_17], %17 {strides = array<i32>} : memref<8x128xf32, #tpu.memory_space<vmem>>, vector<8x128xf32>,
    } else {
    }
    %c0 = arith.constant 0 : index
    %c0_1 = arith.constant 0 : index
    %3 = vector.load %arg8[%c0, %c0_1] : memref<8x128xf32, #tpu.memory_space<vmem>>, vector<8x128xf32>
    %c0_2 = arith.constant 0 : index
    %c0_3 = arith.constant 0 : index
    %4 = vector.load %arg5[%c0_2, %c0_3] : memref<128x128xf32, #tpu.memory_space<vmem>>, vector<128x128xf32>
    %cst = arith.constant dense<0.000000e+00> : vector<8x128xf32>
    %5 = tpu.matmul %3, %4, %cst {dimension_numbers = #tpu.dot_dimension_numbers<[1], [0], [0], [1], [0, 0, 1, 1], [], []>} : vector<8x128xf32>, vector<128x128xf32>, vector<8x128xf32> -> vector<8x128xf32>
    %c0_4 = arith.constant 0 : index
    %c0_5 = arith.constant 0 : index
    %6 = vector.load %arg6[%c0_4, %c0_5] : memref<1x128xf32, #tpu.memory_space<vmem>>, vector<1x128xf32>
    %7 = vector.broadcast %6 : vector<1x128xf32> to vector<8x128xf32>
    %8 = arith.addf %5, %7 : vector<8x128xf32>
    %c0_6 = arith.constant 0 : index
    %c0_7 = arith.constant 0 : index
    %9 = vector.load %arg7[%c0_6, %c0_7] : memref<8x128xf32, #tpu.memory_space<vmem>>, vector<8x128xf32>
    tpu.vector_store %arg7[%c0_6, %c0_7], %8 {strides = array<i32>} : memref<8x128xf32, #tpu.memory_space<vmem>>, vector<8x128xf32>,
    return
  }
  func.func @transform_0(%arg0: i32, %arg1: i32) -> (i32, i32) {
    %c0_i32 = arith.constant 0 : i32
    %c0_i32_0 = arith.constant 0 : i32
    return %arg0, %c0_i32 : i32, i32
  }
  func.func @transform_1(%arg0: i32, %arg1: i32) -> (i32, i32) {
    %c0_i32 = arith.constant 0 : i32
    %c0_i32_0 = arith.constant 0 : i32
    %c0_i32_1 = arith.constant 0 : i32
    return %c0_i32, %c0_i32_0 : i32, i32
  }
  func.func @transform_2(%arg0: i32, %arg1: i32) -> (i32, i32) {
    %c0_i32 = arith.constant 0 : i32
    %c0_i32_0 = arith.constant 0 : i32
    %c0_i32_1 = arith.constant 0 : i32
    return %c0_i32, %c0_i32_0 : i32, i32
  }
  func.func @transform_3(%arg0: i32, %arg1: i32) -> (i32, i32) {
    %c0_i32 = arith.constant 0 : i32
    %c0_i32_0 = arith.constant 0 : i32
    return %c0_i32, %arg1 : i32, i32
  }
  func.func @transform_4(%arg0: i32, %arg1: i32) -> (i32, i32) {
    %c0_i32 = arith.constant 0 : i32
    %c0_i32_0 = arith.constant 0 : i32
    return %c0_i32, %arg1 : i32, i32
  }
  func.func @transform_5(%arg0: i32, %arg1: i32) -> (i32, i32) {
    %c0_i32 = arith.constant 0 : i32
    return %arg0, %arg1 : i32, i32
  }
}

module attributes {stable_mosaic.version = 11 : i64} {
  func.func @mlp_kernel(%arg0: i32, %arg1: i32, %arg2: memref<8x16xf32, #tpu.memory_space<vmem>>, %arg3: memref<16x128xf32, #tpu.memory_space<vmem>>, %arg4: memref<1x128xf32, #tpu.memory_space<vmem>>, %arg5: memref<128x128xf32, #tpu.memory_space<vmem>>, %arg6: memref<1x128xf32, #tpu.memory_space<vmem>>, %arg7: memref<8x128xf32, #tpu.memory_space<vmem>>, %arg8: memref<8x128xf32, #tpu.memory_space<vmem>>) attributes {dimension_semantics = [#tpu.dimension_semantics<parallel>, #tpu.dimension_semantics<arbitrary>], iteration_bounds = array<i64: 1, 1>, scalar_prefetch = 0 : i64, scratch_operands = 1 : i64, tpu.core_type = #tpu.core_type<tc>, window_params = [{transform_indices = @transform_0, window_bounds = array<i64: 8, 16>}, {pipeline_mode = #tpu.pipeline_mode<synchronous>, transform_indices = @transform_1, window_bounds = array<i64: 16, 128>}, {pipeline_mode = #tpu.pipeline_mode<synchronous>, transform_indices = @transform_2, window_bounds = array<i64: 1, 128>}, {transform_indices = @transform_3, window_bounds = array<i64: 128, 128>}, {transform_indices = @transform_4, window_bounds = array<i64: 1, 128>}, {transform_indices = @transform_5, window_bounds = array<i64: 8, 128>}]} {
    %c0_i32 = arith.constant 0 : i32
    %0 = arith.cmpi eq, %arg1, %c0_i32 : i32
    %1 = arith.extui %0 : i1 to i32
    %c0_i32_0 = arith.constant 0 : i32
    %2 = arith.cmpi ne, %1, %c0_i32_0 : i32
    scf.if %2 {
      %c0_8 = arith.constant 0 : index
      %c0_9 = arith.constant 0 : index
      %10 = vector.load %arg2[%c0_8, %c0_9] : memref<8x16xf32, #tpu.memory_space<vmem>>, vector<8x16xf32>
      %c0_10 = arith.constant 0 : index
      %c0_11 = arith.constant 0 : index
      %11 = vector.load %arg3[%c0_10, %c0_11] : memref<16x128xf32, #tpu.memory_space<vmem>>, vector<16x128xf32>
      %cst_12 = arith.constant dense<0.000000e+00> : vector<8x128xf32>
      %12 = tpu.matmul %10, %11, %cst_12 {dimension_numbers = #tpu.dot_dimension_numbers<[1], [0], [0], [1], [0, 0, 1, 1], [], []>} : vector<8x16xf32>, vector<16x128xf32>, vector<8x128xf32> -> vector<8x128xf32>
      %c0_13 = arith.constant 0 : index
      %c0_14 = arith.constant 0 : index
      %13 = vector.load %arg4[%c0_13, %c0_14] : memref<1x128xf32, #tpu.memory_space<vmem>>, vector<1x128xf32>
      %14 = vector.broadcast %13 : vector<1x128xf32> to vector<8x128xf32>
      %15 = arith.addf %12, %14 : vector<8x128xf32>
      %cst_15 = arith.constant 0.000000e+00 : f32
      %16 = vector.broadcast %cst_15 : f32 to vector<8x128xf32>
      %17 = arith.maximumf %15, %16 : vector<8x128xf32>
      %c0_16 = arith.constant 0 : index
      %c0_17 = arith.constant 0 : index
      %18 = vector.load %arg8[%c0_16, %c0_17] : memref<8x128xf32, #tpu.memory_space<vmem>>, vector<8x128xf32>
      tpu.vector_store %arg8[%c0_16, %c0_17], %17 {strides = array<i32>} : memref<8x128xf32, #tpu.memory_space<vmem>>, vector<8x128xf32>,
    } else {
    }
    %c0 = arith.constant 0 : index
    %c0_1 = arith.constant 0 : index
    %3 = vector.load %arg8[%c0, %c0_1] : memref<8x128xf32, #tpu.memory_space<vmem>>, vector<8x128xf32>
    %c0_2 = arith.constant 0 : index
    %c0_3 = arith.constant 0 : index
    %4 = vector.load %arg5[%c0_2, %c0_3] : memref<128x128xf32, #tpu.memory_space<vmem>>, vector<128x128xf32>
    %cst = arith.constant dense<0.000000e+00> : vector<8x128xf32>
    %5 = tpu.matmul %3, %4, %cst {dimension_numbers = #tpu.dot_dimension_numbers<[1], [0], [0], [1], [0, 0, 1, 1], [], []>} : vector<8x128xf32>, vector<128x128xf32>, vector<8x128xf32> -> vector<8x128xf32>
    %c0_4 = arith.constant 0 : index
    %c0_5 = arith.constant 0 : index
    %6 = vector.load %arg6[%c0_4, %c0_5] : memref<1x128xf32, #tpu.memory_space<vmem>>, vector<1x128xf32>
    %7 = vector.broadcast %6 : vector<1x128xf32> to vector<8x128xf32>
    %8 = arith.addf %5, %7 : vector<8x128xf32>
    %c0_6 = arith.constant 0 : index
    %c0_7 = arith.constant 0 : index
    %9 = vector.load %arg7[%c0_6, %c0_7] : memref<8x128xf32, #tpu.memory_space<vmem>>, vector<8x128xf32>
    tpu.vector_store %arg7[%c0_6, %c0_7], %8 {strides = array<i32>} : memref<8x128xf32, #tpu.memory_space<vmem>>, vector<8x128xf32>,
    return
  }
  func.func @transform_0(%arg0: i32, %arg1: i32) -> (i32, i32) {
    %c0_i32 = arith.constant 0 : i32
    %c0_i32_0 = arith.constant 0 : i32
    return %arg0, %c0_i32 : i32, i32
  }
  func.func @transform_1(%arg0: i32, %arg1: i32) -> (i32, i32) {
    %c0_i32 = arith.constant 0 : i32
    %c0_i32_0 = arith.constant 0 : i32
    %c0_i32_1 = arith.constant 0 : i32
    return %c0_i32, %c0_i32_0 : i32, i32
  }
  func.func @transform_2(%arg0: i32, %arg1: i32) -> (i32, i32) {
    %c0_i32 = arith.constant 0 : i32
    %c0_i32_0 = arith.constant 0 : i32
    %c0_i32_1 = arith.constant 0 : i32
    return %c0_i32, %c0_i32_0 : i32, i32
  }
  func.func @transform_3(%arg0: i32, %arg1: i32) -> (i32, i32) {
    %c0_i32 = arith.constant 0 : i32
    %c0_i32_0 = arith.constant 0 : i32
    return %c0_i32, %arg1 : i32, i32
  }
  func.func @transform_4(%arg0: i32, %arg1: i32) -> (i32, i32) {
    %c0_i32 = arith.constant 0 : i32
    %c0_i32_0 = arith.constant 0 : i32
    return %c0_i32, %arg1 : i32, i32
  }
  func.func @transform_5(%arg0: i32, %arg1: i32) -> (i32, i32) {
    %c0_i32 = arith.constant 0 : i32
    return %arg0, %arg1 : i32, i32
  }
}

</mosaic_0001>

<bundles_post_ra>
// kernel: tpu_custom_call.1
= control target key start
LH: loop header
LB: loop body
LE: loop exit
PB: predicated region body
PF: predicated region fallthrough
CT: control target
= control target key end

     0   :  { %10 = vsyncpa [#allocation4], 0  ;;  %s476_s0 = inlined_call_operand.hbm [shape: f32[8,16], index: 0, kind: input, shape index: {}]   ;;  %s477_s1 = inlined_call_operand.hbm [shape: f32[16,128], index: 1, kind: input, shape index: {}]   ;;  %s478_s2 = inlined_call_operand.vmem [shape: f32[1,128], index: 2, kind: input, shape index: {}]   ;;  %s479_s3 = inlined_call_operand.hbm [shape: f32[128,128], index: 3, kind: input, shape index: {}]   ;;  %s480_s4 = inlined_call_operand.vmem [shape: f32[1,128], index: 4, kind: input, shape index: {}]   ;;  %s481_s5 = inlined_call_operand.hbm [shape: f32[8,128], index: 5, kind: output, shape index: {}]  }
   0x1   :  { %11 = vsyncpa [#allocation7], 0 }
   0x2   :  { %12 = vsyncpa [#allocation5], 0  ;;  %s420_s18 = smov [#allocation6]  }
   0x3   :  { %s28_s19 = sshll.u32 %s420_s18, 4  ;;  %s29_s19 = int_to_ptr.vmem [resolvable:$true] %s28_s19 }
   0x4   :  { %s342_s20 = scalar_lea.vmem %s29_s19, 256  ;;  %p347_p1 = scmp.lt.s32.totalorder %s29_s19, %s29_s19 }
   0x5   :  { %p343_p0 = scmp.ne.s32.totalorder %s29_s19, %s342_s20  ;;  %p348_p2 = scmp.lt.s32.totalorder %s342_s20, %s342_s20 }
   0x7   :  { %p349_p3 = por %p348_p2, %p347_p1 }
   0x9   :  { %p350_p4 = pnand %p349_p3, %p343_p0 }
   0xb   :  { %353 = shalt.err (!%p350_p4)
}
   0xc   :  { %s421_s21 = smov 128   ;;  %s422_s22 = smov 8  }
   0xd   :  { %34 = dma.hbm_to_vmem [thread:$0]  %s477_s1, 256, %s29_s19, [#allocation7], %s421_s21, %s421_s21, %s422_s22  }
   0xe   :  { %s423_s25 = smov [#allocation3]   ;;  %s424_s27 = smov [#allocation8]  }
   0xf   :  { %s19_s26 = sshll.u32 %s423_s25, 4  ;;  %s42_s28 = sshll.u32 %s424_s27, 4  ;;  %s20_s26 = int_to_ptr.vmem [resolvable:$true] %s19_s26  ;;  %s43_s28 = int_to_ptr.vmem [resolvable:$true] %s42_s28 }
  0x10   :  { %s362_s29 = scalar_lea.vmem %s20_s26, 128  ;;  %p367_p6 = scmp.lt.s32.totalorder %s20_s26, %s20_s26 }
  0x11   :  { %p363_p5 = scmp.ne.s32.totalorder %s20_s26, %s362_s29  ;;  %p368_p7 = scmp.lt.s32.totalorder %s362_s29, %s362_s29 }
  0x13   :  { %p369_p8 = por %p368_p7, %p367_p6 }
  0x15   :  { %p370_p9 = pnand %p369_p8, %p363_p5 }
  0x17   :  { %373 = shalt.err (!%p370_p9)
}
  0x18   :  { %22 = dma.hbm_to_vmem [thread:$0]  %s476_s0, 128, %s20_s26, [#allocation4]  }
  0x19   :  { %s382_s7 = scalar_lea.vmem %s43_s28, 2048  ;;  %p387_p11 = scmp.lt.s32.totalorder %s43_s28, %s43_s28 }
  0x1a   :  { %p383_p10 = scmp.ne.s32.totalorder %s43_s28, %s382_s7  ;;  %p388_p12 = scmp.lt.s32.totalorder %s382_s7, %s382_s7 }
  0x1c   :  { %p389_p13 = por %p388_p12, %p387_p11 }
  0x1e   :  { %p390_p0 = pnand %p389_p13, %p383_p10 }
  0x20   :  { %393 = shalt.err (!%p390_p0)
}
  0x21   :  { %48 = dma.hbm_to_vmem [thread:$0]  %s479_s3, 2048, %s43_s28, [#allocation7], %s421_s21, %s421_s21, %s422_s22  }
  0x22   :  { %414 = dma.done.wait [#allocation4], 128  }
  0x23   :  { %415 = vsyncadd [#allocation4], 4294967168 }
  0x24   :  { %416 = dma.done.wait [#allocation7], 2304  }
  0x25   :  { %417 = vsyncadd [#allocation7], 4294964992  ;;  %v425_v0 = vmov 0.0   ;;  %vm426_vm0 = vmmov 0   ;;  %v66_v1 = vld [vmem:[#allocation6 + $0x8] sm:$0xff]  ;;  %v65_v2 = vld [vmem:[#allocation6] sm:$0xff] }
  0x26   :  { %284 = vmatprep.subr.mxu0 %v425_v0  ;;  %288 = vmatprep.mubr.msk.f32.mxu0 %vm426_vm0, %v425_v0  ;;  %v64_v3 = vld [vmem:[#allocation3] sm:$0xff]  ;;  %vm74_vm1 = vcmask 130048   ;;  %v166_v4 = vld [vmem:[#allocation8 + $0x78] sm:$0xff]  ;;  %v165_v5 = vld [vmem:[#allocation8 + $0x70] sm:$0xff]  ;;  %s427_s11 = smov [#allocation9]  }
  0x27   :  { %291 = vmatprep.subr.mxu1 %v425_v0  ;;  %323 = vmatprep.mubr.msk.f32.mxu1 %vm426_vm0, %v425_v0  ;;  %v164_v6 = vld [vmem:[#allocation8 + $0x68] sm:$0xff]  ;;  %v163_v7 = vld [vmem:[#allocation8 + $0x60] sm:$0xff]  ;;  %v162_v8 = vld [vmem:[#allocation8 + $0x58] sm:$0xff]  ;;  %s251_s12 = sshll.u32 %s427_s11, 4  ;;  %s252_s12 = int_to_ptr.vmem [resolvable:$true] %s251_s12 }
  0x28   :  { %285 = vmatpush3.msra.mxu0 %v66_v1  ;;  %292 = vmatpush3.msra.mxu1 %v166_v4  ;;  %v161_v9 = vld [vmem:[#allocation8 + $0x50] sm:$0xff]  ;;  %v160_v10 = vld [vmem:[#allocation8 + $0x48] sm:$0xff]  ;;  %v159_v11 = vld [vmem:[#allocation8 + $0x40] sm:$0xff]  ;;  %s394_s13 = scalar_lea.vmem %s252_s12, 128  ;;  %p399_p2 = scmp.lt.s32.totalorder %s252_s12, %s252_s12 }
  0x29   :  { %286 = vmatprep.subr.mxu0 %v425_v0  ;;  %293 = vmatprep.subr.mxu1 %v425_v0  ;;  %v158_v12 = vld [vmem:[#allocation8 + $0x38] sm:$0xff]  ;;  %v157_v13 = vld [vmem:[#allocation8 + $0x30] sm:$0xff]  ;;  %v156_v14 = vld [vmem:[#allocation8 + $0x28] sm:$0xff]  ;;  %p395_p1 = scmp.ne.s32.totalorder %s252_s12, %s394_s13  ;;  %p400_p3 = scmp.lt.s32.totalorder %s394_s13, %s394_s13 }
  0x2a   :  { %287 = vmatpush3.msra.mxu0 %v65_v2  ;;  %294 = vmatpush3.msra.mxu1 %v165_v5  ;;  %v155_v15 = vld [vmem:[#allocation8 + $0x20] sm:$0xff]  ;;  %v154_v16 = vld [vmem:[#allocation8 + $0x18] sm:$0xff]  ;;  %v153_v17 = vld [vmem:[#allocation8 + $0x10] sm:$0xff] }
  0x2b   :  { %289 = vmatmul.mubr.msk.f32.vlgmr.msra.gmra.mxu0 %vm74_vm1, %v64_v3  ;;  %295 = vmatprep.subr.mxu1 %v425_v0  ;;  %v152_v18 = vld [vmem:[#allocation8 + $0x8] sm:$0xff]  ;;  %v151_v19 = vld [vmem:[#allocation8] sm:$0xff]  ;;  %p401_p4 = por %p400_p3, %p399_p2 }
  0x2c   :  { %296 = vmatpush3.msra.mxu1 %v164_v6  ;;  %v261_v20 = vld [vmem:[%s478_s2] ss:$0 sm:$0xff] }
  0x2d   :  { %297 = vmatprep.subr.mxu1 %v425_v0  ;;  %v263_v25 = vld [vmem:[%s480_s4] ss:$0 sm:$0xff]  ;;  %p402_p5 = pnand %p401_p4, %p395_p1 }
  0x2e   :  { %298 = vmatpush3.msra.mxu1 %v163_v7 }
  0x2f   :  { %299 = vmatprep.subr.mxu1 %v425_v0 }
  0x30   :  { %300 = vmatpush3.msra.mxu1 %v162_v8 }
  0x31   :  { %301 = vmatprep.subr.mxu1 %v425_v0 }
  0x32   :  { %302 = vmatpush3.msra.mxu1 %v161_v9 }
  0x33   :  { %303 = vmatprep.subr.mxu1 %v425_v0 }
  0x34   :  { %304 = vmatpush3.msra.mxu1 %v160_v10 }
  0x35   :  { %305 = vmatprep.subr.mxu1 %v425_v0 }
  0x36   :  { %306 = vmatpush3.msra.mxu1 %v159_v11 }
  0x37   :  { %307 = vmatprep.subr.mxu1 %v425_v0 }
  0x38   :  { %308 = vmatpush3.msra.mxu1 %v158_v12 }
  0x39   :  { %309 = vmatprep.subr.mxu1 %v425_v0 }
  0x3a   :  { %310 = vmatpush3.msra.mxu1 %v157_v13 }
  0x3b   :  { %311 = vmatprep.subr.mxu1 %v425_v0 }
  0x3c   :  { %312 = vmatpush3.msra.mxu1 %v156_v14 }
  0x3d   :  { %313 = vmatprep.subr.mxu1 %v425_v0 }
  0x3e   :  { %314 = vmatpush3.msra.mxu1 %v155_v15 }
  0x3f   :  { %315 = vmatprep.subr.mxu1 %v425_v0 }
  0x40   :  { %316 = vmatpush3.msra.mxu1 %v154_v16 }
  0x41   :  { %317 = vmatprep.subr.mxu1 %v425_v0 }
  0x42   :  { %318 = vmatpush3.msra.mxu1 %v153_v17 }
  0x43   :  { %319 = vmatprep.subr.mxu1 %v425_v0 }
  0x44   :  { %320 = vmatpush3.msra.mxu1 %v152_v18 }
  0x45   :  { %321 = vmatprep.subr.mxu1 %v425_v0 }
  0x46   :  { %322 = vmatpush3.msra.mxu1 %v151_v19 }
  0xeb   :  { %v144_v21 = vpop.f32.mrf.mxu0 }
  0xec   :  { %v145_v22 = vadd.f32 %v261_v20, %v144_v21 }
  0xed   :  { %v290_v23 = vpop.f32.mrf.mxu0 }
  0xee   :  { %v148_v24 = vmax.f32 %v145_v22, 0.0 }
  0xf0   :  { %324 = vmatmul.mubr.f32.vlgmr.msra.gmra.mxu1 %v148_v24 }
 0x1b0   :  { %v240_v26 = vpop.f32.mrf.mxu1 }
 0x1b1   :  { %v241_v27 = vadd.f32 %v263_v25, %v240_v26 }
 0x1b2   :  { %v325_v28 = vpop.f32.mrf.mxu1 }
 0x1b3   :  { %244 = vst [vmem:[#allocation9] sm:$0xff] %v241_v27 }
 0x1b4   :  { %405 = shalt.err (!%p402_p5)
}
 0x1b5   :  { %254 = dma.vmem_to_hbm [thread:$0]  %s252_s12, 128, %s481_s5, [#allocation5]  }
 0x1b6   :  { %418 = dma.done.wait [#allocation5], 128  }
 0x1b7   :  { %419 = vsyncadd [#allocation5], 4294967168 }
 0x1b8   :  { %258 = vsyncpa [#allocation4], 1 }
 0x1b9   :  { %259 = vsyncpa [#allocation7], 1 }
 0x1ba   :  { %260 = vsyncpa [#allocation5], 1 }

// kernel: tpu_custom_call.1
= control target key start
LH: loop header
LB: loop body
LE: loop exit
PB: predicated region body
PF: predicated region fallthrough
CT: control target
= control target key end

     0   :  { %10 = vsyncpa [#allocation4], 0  ;;  %s476_s0 = inlined_call_operand.hbm [shape: f32[8,16], index: 0, kind: input, shape index: {}]   ;;  %s477_s1 = inlined_call_operand.hbm [shape: f32[16,128], index: 1, kind: input, shape index: {}]   ;;  %s478_s2 = inlined_call_operand.vmem [shape: f32[1,128], index: 2, kind: input, shape index: {}]   ;;  %s479_s3 = inlined_call_operand.hbm [shape: f32[128,128], index: 3, kind: input, shape index: {}]   ;;  %s480_s4 = inlined_call_operand.vmem [shape: f32[1,128], index: 4, kind: input, shape index: {}]   ;;  %s481_s5 = inlined_call_operand.hbm [shape: f32[8,128], index: 5, kind: output, shape index: {}]  }
   0x1   :  { %11 = vsyncpa [#allocation7], 0 }
   0x2   :  { %12 = vsyncpa [#allocation5], 0  ;;  %s420_s18 = smov [#allocation6]  }
   0x3   :  { %s28_s19 = sshll.u32 %s420_s18, 4  ;;  %s29_s19 = int_to_ptr.vmem [resolvable:$true] %s28_s19 }
   0x4   :  { %s342_s20 = scalar_lea.vmem %s29_s19, 256  ;;  %p347_p1 = scmp.lt.s32.totalorder %s29_s19, %s29_s19 }
   0x5   :  { %p343_p0 = scmp.ne.s32.totalorder %s29_s19, %s342_s20  ;;  %p348_p2 = scmp.lt.s32.totalorder %s342_s20, %s342_s20 }
   0x7   :  { %p349_p3 = por %p348_p2, %p347_p1 }
   0x9   :  { %p350_p4 = pnand %p349_p3, %p343_p0 }
   0xb   :  { %353 = shalt.err (!%p350_p4)
}
   0xc   :  { %s421_s21 = smov 128   ;;  %s422_s22 = smov 8  }
   0xd   :  { %34 = dma.hbm_to_vmem [thread:$0]  %s477_s1, 256, %s29_s19, [#allocation7], %s421_s21, %s421_s21, %s422_s22  }
   0xe   :  { %s423_s25 = smov [#allocation3]   ;;  %s424_s27 = smov [#allocation8]  }
   0xf   :  { %s19_s26 = sshll.u32 %s423_s25, 4  ;;  %s42_s28 = sshll.u32 %s424_s27, 4  ;;  %s20_s26 = int_to_ptr.vmem [resolvable:$true] %s19_s26  ;;  %s43_s28 = int_to_ptr.vmem [resolvable:$true] %s42_s28 }
  0x10   :  { %s362_s29 = scalar_lea.vmem %s20_s26, 128  ;;  %p367_p6 = scmp.lt.s32.totalorder %s20_s26, %s20_s26 }
  0x11   :  { %p363_p5 = scmp.ne.s32.totalorder %s20_s26, %s362_s29  ;;  %p368_p7 = scmp.lt.s32.totalorder %s362_s29, %s362_s29 }
  0x13   :  { %p369_p8 = por %p368_p7, %p367_p6 }
  0x15   :  { %p370_p9 = pnand %p369_p8, %p363_p5 }
  0x17   :  { %373 = shalt.err (!%p370_p9)
}
  0x18   :  { %22 = dma.hbm_to_vmem [thread:$0]  %s476_s0, 128, %s20_s26, [#allocation4]  }
  0x19   :  { %s382_s7 = scalar_lea.vmem %s43_s28, 2048  ;;  %p387_p11 = scmp.lt.s32.totalorder %s43_s28, %s43_s28 }
  0x1a   :  { %p383_p10 = scmp.ne.s32.totalorder %s43_s28, %s382_s7  ;;  %p388_p12 = scmp.lt.s32.totalorder %s382_s7, %s382_s7 }
  0x1c   :  { %p389_p13 = por %p388_p12, %p387_p11 }
  0x1e   :  { %p390_p0 = pnand %p389_p13, %p383_p10 }
  0x20   :  { %393 = shalt.err (!%p390_p0)
}
  0x21   :  { %48 = dma.hbm_to_vmem [thread:$0]  %s479_s3, 2048, %s43_s28, [#allocation7], %s421_s21, %s421_s21, %s422_s22  }
  0x22   :  { %414 = dma.done.wait [#allocation4], 128  }
  0x23   :  { %415 = vsyncadd [#allocation4], 4294967168 }
  0x24   :  { %416 = dma.done.wait [#allocation7], 2304  }
  0x25   :  { %417 = vsyncadd [#allocation7], 4294964992  ;;  %v425_v0 = vmov 0.0   ;;  %vm426_vm0 = vmmov 0   ;;  %v66_v1 = vld [vmem:[#allocation6 + $0x8] sm:$0xff]  ;;  %v65_v2 = vld [vmem:[#allocation6] sm:$0xff] }
  0x26   :  { %284 = vmatprep.subr.mxu0 %v425_v0  ;;  %288 = vmatprep.mubr.msk.f32.mxu0 %vm426_vm0, %v425_v0  ;;  %v64_v3 = vld [vmem:[#allocation3] sm:$0xff]  ;;  %vm74_vm1 = vcmask 130048   ;;  %v166_v4 = vld [vmem:[#allocation8 + $0x78] sm:$0xff]  ;;  %v165_v5 = vld [vmem:[#allocation8 + $0x70] sm:$0xff]  ;;  %s427_s11 = smov [#allocation9]  }
  0x27   :  { %291 = vmatprep.subr.mxu1 %v425_v0  ;;  %323 = vmatprep.mubr.msk.f32.mxu1 %vm426_vm0, %v425_v0  ;;  %v164_v6 = vld [vmem:[#allocation8 + $0x68] sm:$0xff]  ;;  %v163_v7 = vld [vmem:[#allocation8 + $0x60] sm:$0xff]  ;;  %v162_v8 = vld [vmem:[#allocation8 + $0x58] sm:$0xff]  ;;  %s251_s12 = sshll.u32 %s427_s11, 4  ;;  %s252_s12 = int_to_ptr.vmem [resolvable:$true] %s251_s12 }
  0x28   :  { %285 = vmatpush3.msra.mxu0 %v66_v1  ;;  %292 = vmatpush3.msra.mxu1 %v166_v4  ;;  %v161_v9 = vld [vmem:[#allocation8 + $0x50] sm:$0xff]  ;;  %v160_v10 = vld [vmem:[#allocation8 + $0x48] sm:$0xff]  ;;  %v159_v11 = vld [vmem:[#allocation8 + $0x40] sm:$0xff]  ;;  %s394_s13 = scalar_lea.vmem %s252_s12, 128  ;;  %p399_p2 = scmp.lt.s32.totalorder %s252_s12, %s252_s12 }
  0x29   :  { %286 = vmatprep.subr.mxu0 %v425_v0  ;;  %293 = vmatprep.subr.mxu1 %v425_v0  ;;  %v158_v12 = vld [vmem:[#allocation8 + $0x38] sm:$0xff]  ;;  %v157_v13 = vld [vmem:[#allocation8 + $0x30] sm:$0xff]  ;;  %v156_v14 = vld [vmem:[#allocation8 + $0x28] sm:$0xff]  ;;  %p395_p1 = scmp.ne.s32.totalorder %s252_s12, %s394_s13  ;;  %p400_p3 = scmp.lt.s32.totalorder %s394_s13, %s394_s13 }
  0x2a   :  { %287 = vmatpush3.msra.mxu0 %v65_v2  ;;  %294 = vmatpush3.msra.mxu1 %v165_v5  ;;  %v155_v15 = vld [vmem:[#allocation8 + $0x20] sm:$0xff]  ;;  %v154_v16 = vld [vmem:[#allocation8 + $0x18] sm:$0xff]  ;;  %v153_v17 = vld [vmem:[#allocation8 + $0x10] sm:$0xff] }
  0x2b   :  { %289 = vmatmul.mubr.msk.f32.vlgmr.msra.gmra.mxu0 %vm74_vm1, %v64_v3  ;;  %295 = vmatprep.subr.mxu1 %v425_v0  ;;  %v152_v18 = vld [vmem:[#allocation8 + $0x8] sm:$0xff]  ;;  %v151_v19 = vld [vmem:[#allocation8] sm:$0xff]  ;;  %p401_p4 = por %p400_p3, %p399_p2 }
  0x2c   :  { %296 = vmatpush3.msra.mxu1 %v164_v6  ;;  %v261_v20 = vld [vmem:[%s478_s2] ss:$0 sm:$0xff] }
  0x2d   :  { %297 = vmatprep.subr.mxu1 %v425_v0  ;;  %v263_v25 = vld [vmem:[%s480_s4] ss:$0 sm:$0xff]  ;;  %p402_p5 = pnand %p401_p4, %p395_p1 }
  0x2e   :  { %298 = vmatpush3.msra.mxu1 %v163_v7 }
  0x2f   :  { %299 = vmatprep.subr.mxu1 %v425_v0 }
  0x30   :  { %300 = vmatpush3.msra.mxu1 %v162_v8 }
  0x31   :  { %301 = vmatprep.subr.mxu1 %v425_v0 }
  0x32   :  { %302 = vmatpush3.msra.mxu1 %v161_v9 }
  0x33   :  { %303 = vmatprep.subr.mxu1 %v425_v0 }
  0x34   :  { %304 = vmatpush3.msra.mxu1 %v160_v10 }
  0x35   :  { %305 = vmatprep.subr.mxu1 %v425_v0 }
  0x36   :  { %306 = vmatpush3.msra.mxu1 %v159_v11 }
  0x37   :  { %307 = vmatprep.subr.mxu1 %v425_v0 }
  0x38   :  { %308 = vmatpush3.msra.mxu1 %v158_v12 }
  0x39   :  { %309 = vmatprep.subr.mxu1 %v425_v0 }
  0x3a   :  { %310 = vmatpush3.msra.mxu1 %v157_v13 }
  0x3b   :  { %311 = vmatprep.subr.mxu1 %v425_v0 }
  0x3c   :  { %312 = vmatpush3.msra.mxu1 %v156_v14 }
  0x3d   :  { %313 = vmatprep.subr.mxu1 %v425_v0 }
  0x3e   :  { %314 = vmatpush3.msra.mxu1 %v155_v15 }
  0x3f   :  { %315 = vmatprep.subr.mxu1 %v425_v0 }
  0x40   :  { %316 = vmatpush3.msra.mxu1 %v154_v16 }
  0x41   :  { %317 = vmatprep.subr.mxu1 %v425_v0 }
  0x42   :  { %318 = vmatpush3.msra.mxu1 %v153_v17 }
  0x43   :  { %319 = vmatprep.subr.mxu1 %v425_v0 }
  0x44   :  { %320 = vmatpush3.msra.mxu1 %v152_v18 }
  0x45   :  { %321 = vmatprep.subr.mxu1 %v425_v0 }
  0x46   :  { %322 = vmatpush3.msra.mxu1 %v151_v19 }
  0xeb   :  { %v144_v21 = vpop.f32.mrf.mxu0 }
  0xec   :  { %v145_v22 = vadd.f32 %v261_v20, %v144_v21 }
  0xed   :  { %v290_v23 = vpop.f32.mrf.mxu0 }
  0xee   :  { %v148_v24 = vmax.f32 %v145_v22, 0.0 }
  0xf0   :  { %324 = vmatmul.mubr.f32.vlgmr.msra.gmra.mxu1 %v148_v24 }
 0x1b0   :  { %v240_v26 = vpop.f32.mrf.mxu1 }
 0x1b1   :  { %v241_v27 = vadd.f32 %v263_v25, %v240_v26 }
 0x1b2   :  { %v325_v28 = vpop.f32.mrf.mxu1 }
 0x1b3   :  { %244 = vst [vmem:[#allocation9] sm:$0xff] %v241_v27 }
 0x1b4   :  { %405 = shalt.err (!%p402_p5)
}
 0x1b5   :  { %254 = dma.vmem_to_hbm [thread:$0]  %s252_s12, 128, %s481_s5, [#allocation5]  }
 0x1b6   :  { %418 = dma.done.wait [#allocation5], 128  }
 0x1b7   :  { %419 = vsyncadd [#allocation5], 4294967168 }
 0x1b8   :  { %258 = vsyncpa [#allocation4], 1 }
 0x1b9   :  { %259 = vsyncpa [#allocation7], 1 }
 0x1ba   :  { %260 = vsyncpa [#allocation5], 1 }

</bundles_post_ra>
